<compile_context>
chip_gen: v5e
topology: v5e:2x2
jax: 0.10.0
libtpu: 0.0.40
codegen_flags: <defaults>
</compile_context>

<pallas_src>
import functools

import jax
import jax.numpy as jnp
from jax import lax
from jax.experimental import pallas as pl
from jax.experimental.pallas import tpu as pltpu


def _round_up(x, m):
    return ((x + m - 1) // m) * m


@functools.lru_cache(maxsize=None)
def _vmem_budget_bytes():
    """Generation-aware VMEM budget (64 MiB/TC on v7x, 128 MiB on v5e/v6e)."""
    try:
        cap = int(pltpu.get_tpu_info().vmem_capacity_bytes)
    except Exception:  # unknown generation / interpret mode
        cap = 128 * 1024 * 1024
    return (cap * 3) // 4  # leave headroom for compiler-internal scratch


# ---------------------------------------------------------------------------
# Path 1 (default): memory-bound DMA row gather.
# ---------------------------------------------------------------------------

_INFLIGHT_ROWS = 16  # max outstanding row DMAs per tile


def _gather_kernel(ids_ref, table_hbm, out_ref, buf_ref, sem):
    # ids_ref:   (N_pad,) int32 in SMEM (scalar prefetch)
    # table_hbm: (V, E) table left in HBM (pl.ANY) — no auto-DMA
    # out_ref:   (T, E) VMEM output block for this tile
    # buf_ref:   (T, E) VMEM scratch the row DMAs land in
    # sem:       one DMA semaphore shared by all (equal-sized) row copies
    T = out_ref.shape[0]
    base = pl.program_id(0) * T
    W = min(_INFLIGHT_ROWS, T)

    def row_copy(dst_row, src_row):
        return pltpu.make_async_copy(
            table_hbm.at[pl.ds(src_row, 1), :],
            buf_ref.at[pl.ds(dst_row, 1), :],
            sem,
        )

    def issue(t, carry):
        row_copy(t, ids_ref[base + t]).start()

        @pl.when(t >= W)
        def _():
            # Every row copy moves the same number of bytes, so waiting on any
            # same-shaped descriptor retires exactly one outstanding row.
            row_copy(t - W, 0).wait()

        return carry

    lax.fori_loop(0, T, issue, 0)

    def drain(t, carry):
        row_copy(t, 0).wait()
        return carry

    lax.fori_loop(max(T - W, 0), T, drain, 0)

    out_ref[...] = buf_ref[...]


def _embedding_gather(ids, table, *, block_tokens):
    N = ids.shape[0]
    V, E = table.shape
    itemsize = jnp.dtype(table.dtype).itemsize

    # Tokens per tile: multiple of 8 (sublane alignment of the (T, E) output
    # block), capped so scratch + double-buffered output stay inside VMEM.
    t_cap = (_vmem_budget_bytes() // 4) // max(3 * E * itemsize, 1)
    t_cap = max(8, (t_cap // 8) * 8)
    T = min(block_tokens, t_cap, _round_up(N, 8))
    T = max(8, (T // 8) * 8)

    num_tiles = pl.cdiv(N, T)
    N_pad = num_tiles * T
    if N_pad != N:
        ids = jnp.pad(ids, (0, N_pad - N))  # pad with id 0 (valid row), dropped later

    # Pure gather: ~0 flops; touches only the requested rows + the output.
    cost = pl.CostEstimate(
        flops=0,
        transcendentals=0,
        bytes_accessed=N_pad * 4 + 2 * N_pad * E * itemsize,
    )

    out = pl.pallas_call(
        _gather_kernel,
        out_shape=jax.ShapeDtypeStruct((N_pad, E), table.dtype),
        grid_spec=pltpu.PrefetchScalarGridSpec(
            num_scalar_prefetch=1,                      # ids -> SMEM
            grid=(num_tiles,),
            in_specs=[pl.BlockSpec(memory_space=pl.ANY)],  # table stays in HBM
            out_specs=pl.BlockSpec((T, E), lambda i, ids_ref: (i, 0)),
            scratch_shapes=[
                pltpu.VMEM((T, E), table.dtype),
                pltpu.SemaphoreType.DMA(()),
            ],
        ),
        compiler_params=pltpu.CompilerParams(
            dimension_semantics=("parallel",),  # tiles independent -> 2 TCs on v7x
            vmem_limit_bytes=_vmem_budget_bytes(),
        ),
        cost_estimate=cost,
    )(ids, table)
    return out[:N]


# ---------------------------------------------------------------------------
# Path 2: one-hot @ table MXU matmul — tiny vocabularies only.
# ---------------------------------------------------------------------------

_MATMUL_VOCAB_MAX = 256  # below the MXU/HBM crossover on all current gens


def _onehot_matmul_kernel(ids_ref, table_ref, out_ref):
    # ids_ref:   (T, 1) int32   — sublane-oriented token ids for this tile
    # table_ref: (V, E_pad)     — full table, VMEM-resident (grid-invariant)
    # out_ref:   (T, E_pad)
    T = out_ref.shape[0]
    V = table_ref.shape[0]
    ids = ids_ref[...]                                          # (T, 1)
    vocab_iota = lax.broadcasted_iota(jnp.int32, (T, V), 1)     # [t, v] = v
    one_hot = (ids == vocab_iota).astype(table_ref.dtype)       # (T, V)
    # HIGHEST keeps f32 tables bit-exact through the MXU; V is tiny so the
    # multi-pass cost is negligible.
    out_ref[...] = jnp.dot(
        one_hot,
        table_ref[...],
        preferred_element_type=jnp.float32,
        precision=lax.Precision.HIGHEST,
    ).astype(out_ref.dtype)


def _embedding_onehot_matmul(ids, table, *, block_tokens):
    N = ids.shape[0]
    V, E = table.shape
    itemsize = jnp.dtype(table.dtype).itemsize

    # Lane-dense output blocks: pad E to a multiple of 128 (unmasked vst).
    # The table on this path is tiny, so padding it is cheap.
    E_pad = _round_up(E, 128)
    if E_pad != E:
        table = jnp.pad(table, ((0, 0), (0, E_pad - E)))

    T = min(block_tokens, _round_up(N, 8))
    T = max(8, (T // 8) * 8)
    num_tiles = pl.cdiv(N, T)
    N_pad = num_tiles * T
    if N_pad != N:
        ids = jnp.pad(ids, (0, N_pad - N))
    ids2d = ids.reshape(N_pad, 1)

    cost = pl.CostEstimate(
        flops=2 * N_pad * V * E_pad,
        transcendentals=0,
        bytes_accessed=N_pad * 4 + V * E_pad * itemsize + N_pad * E_pad * itemsize,
    )

    def _run(single_buffer_table):
        table_kwargs = {}
        if single_buffer_table:
            # Grid-invariant block: double buffering it only doubles its VMEM
            # footprint for zero overlap benefit.
            table_kwargs["pipeline_mode"] = pl.Buffered(1)
        return pl.pallas_call(
            _onehot_matmul_kernel,
            out_shape=jax.ShapeDtypeStruct((N_pad, E_pad), table.dtype),
            grid_spec=pltpu.PrefetchScalarGridSpec(
                num_scalar_prefetch=0,
                grid=(num_tiles,),
                in_specs=[
                    pl.BlockSpec((T, 1), lambda i: (i, 0)),
                    pl.BlockSpec((V, E_pad), lambda i: (0, 0), **table_kwargs),
                ],
                out_specs=pl.BlockSpec((T, E_pad), lambda i: (i, 0)),
            ),
            compiler_params=pltpu.CompilerParams(
                dimension_semantics=("parallel",),
                vmem_limit_bytes=_vmem_budget_bytes(),
            ),
            cost_estimate=cost,
        )(ids2d, table)

    try:
        out = _run(True)
    except Exception:
        # Single-buffer hint unsupported on this jax version; fall back to the
        # default double-buffered (still tiny) resident table block.
        out = _run(False)

    return out[:N, :E]


# ---------------------------------------------------------------------------
# Public wrapper.
# ---------------------------------------------------------------------------

def input_embedding(x, table, *, block_tokens=512, force_gather=False):
    """Pallas equivalent of PyTorch nn.Embedding(V, E)(x): table[x].

    x:     integer ids, any shape (e.g. (B, S))
    table: (V, E) embedding weights
    returns x.shape + (E,), dtype == table.dtype
    """
    V, E = table.shape
    lead_shape = x.shape
    ids = x.reshape(-1).astype(jnp.int32)
    # TODO(synk): PyTorch raises on out-of-range ids; we clamp instead (no
    # clean in-kernel exception path on TPU).
    ids = jnp.clip(ids, 0, V - 1)

    itemsize = jnp.dtype(table.dtype).itemsize
    table_bytes = V * _round_up(E, 128) * itemsize
    use_matmul = (
        not force_gather
        and jnp.issubdtype(table.dtype, jnp.floating)  # v7x MXU has no int path
        and V <= _MATMUL_VOCAB_MAX
        and table_bytes <= _vmem_budget_bytes() // 2
    )
    if use_matmul:
        out = _embedding_onehot_matmul(ids, table, block_tokens=block_tokens)
    else:
        out = _embedding_gather(ids, table, block_tokens=block_tokens)
    return out.reshape(*lead_shape, E)


if __name__ == "__main__":
    # Small, deterministic setup consistent with the module's __init__.
    vocab_size = 64
    embedding_size = 128
    batch, seq = 2, 8

    key = jax.random.PRNGKey(0)
    k_tab, k_ids = jax.random.split(key)

    # nn.Embedding default init: weights ~ N(0, 1)
    table = jax.random.normal(k_tab, (vocab_size, embedding_size), dtype=jnp.float32)
    x = jax.random.randint(k_ids, (batch, seq), 0, vocab_size, dtype=jnp.int32)

    ref = jnp.take(table, x, axis=0)

    # Tiny-vocab path (VMEM-resident table, one-hot MXU matmul).
    out_small = jax.block_until_ready(input_embedding(x, table))
    assert out_small.shape == (batch, seq, embedding_size)
    assert out_small.dtype == table.dtype
    assert jnp.allclose(out_small, ref), "matmul path mismatch vs jnp.take"

    # Production path (SMEM ids + HBM table + DMA row gather), forced here so
    # both code paths are exercised on-device at small shapes.
    out_gather = jax.block_until_ready(input_embedding(x, table, force_gather=True))
    assert out_gather.shape == (batch, seq, embedding_size)
    assert out_gather.dtype == table.dtype
    assert jnp.array_equal(out_gather, ref), "gather path mismatch vs jnp.take"

    print("KERNEL_OK")
</pallas_src>

<mosaic_0001>
module attributes {stable_mosaic.version = 11 : i64} {
  func.func @_onehot_matmul_kernel(%arg0: i32, %arg1: memref<16x1xi32, #tpu.memory_space<vmem>>, %arg2: memref<64x128xf32, #tpu.memory_space<vmem>>, %arg3: memref<16x128xf32, #tpu.memory_space<vmem>>) attributes {dimension_semantics = [#tpu.dimension_semantics<parallel>], iteration_bounds = array<i64: 1>, scalar_prefetch = 0 : i64, scratch_operands = 0 : i64, tpu.core_type = #tpu.core_type<tc>, window_params = [{transform_indices = @transform_0, window_bounds = array<i64: 16, 1>}, {pipeline_mode = #tpu.pipeline_mode<synchronous>, transform_indices = @transform_1, window_bounds = array<i64: 64, 128>}, {transform_indices = @transform_2, window_bounds = array<i64: 16, 128>}]} {
    %c0 = arith.constant 0 : index
    %c0_0 = arith.constant 0 : index
    %0 = vector.load %arg1[%c0, %c0_0] : memref<16x1xi32, #tpu.memory_space<vmem>>, vector<16x1xi32>
    %1 = tpu.iota {dimensions = array<i32: 1>} : vector<16x64xi32>
    %2 = vector.broadcast %0 : vector<16x1xi32> to vector<16x64xi32>
    %3 = arith.cmpi eq, %2, %1 : vector<16x64xi32>
    %4 = arith.extui %3 : vector<16x64xi1> to vector<16x64xi32>
    %5 = arith.sitofp %4 : vector<16x64xi32> to vector<16x64xf32>
    %c0_1 = arith.constant 0 : index
    %c0_2 = arith.constant 0 : index
    %6 = vector.load %arg2[%c0_1, %c0_2] : memref<64x128xf32, #tpu.memory_space<vmem>>, vector<64x128xf32>
    %cst = arith.constant dense<0.000000e+00> : vector<16x128xf32>
    %7 = tpu.matmul %5, %6, %cst {dimension_numbers = #tpu.dot_dimension_numbers<[1], [0], [0], [1], [0, 0, 1, 1], [], []>, precision = #tpu.contract_precision<fp32>} : vector<16x64xf32>, vector<64x128xf32>, vector<16x128xf32> -> vector<16x128xf32>
    %c0_3 = arith.constant 0 : index
    %c0_4 = arith.constant 0 : index
    %8 = vector.load %arg3[%c0_3, %c0_4] : memref<16x128xf32, #tpu.memory_space<vmem>>, vector<16x128xf32>
    tpu.vector_store %arg3[%c0_3, %c0_4], %7 {strides = array<i32>} : memref<16x128xf32, #tpu.memory_space<vmem>>, vector<16x128xf32>,
    return
  }
  func.func @transform_0(%arg0: i32) -> (i32, i32) {
    %c0_i32 = arith.constant 0 : i32
    %c0_i32_0 = arith.constant 0 : i32
    return %arg0, %c0_i32 : i32, i32
  }
  func.func @transform_1(%arg0: i32) -> (i32, i32) {
    %c0_i32 = arith.constant 0 : i32
    %c0_i32_0 = arith.constant 0 : i32
    %c0_i32_1 = arith.constant 0 : i32
    return %c0_i32, %c0_i32_0 : i32, i32
  }
  func.func @transform_2(%arg0: i32) -> (i32, i32) {
    %c0_i32 = arith.constant 0 : i32
    %c0_i32_0 = arith.constant 0 : i32
    return %arg0, %c0_i32 : i32, i32
  }
}

module attributes {stable_mosaic.version = 11 : i64} {
  func.func @_onehot_matmul_kernel(%arg0: i32, %arg1: memref<16x1xi32, #tpu.memory_space<vmem>>, %arg2: memref<64x128xf32, #tpu.memory_space<vmem>>, %arg3: memref<16x128xf32, #tpu.memory_space<vmem>>) attributes {dimension_semantics = [#tpu.dimension_semantics<parallel>], iteration_bounds = array<i64: 1>, scalar_prefetch = 0 : i64, scratch_operands = 0 : i64, tpu.core_type = #tpu.core_type<tc>, window_params = [{transform_indices = @transform_0, window_bounds = array<i64: 16, 1>}, {pipeline_mode = #tpu.pipeline_mode<synchronous>, transform_indices = @transform_1, window_bounds = array<i64: 64, 128>}, {transform_indices = @transform_2, window_bounds = array<i64: 16, 128>}]} {
    %c0 = arith.constant 0 : index
    %c0_0 = arith.constant 0 : index
    %0 = vector.load %arg1[%c0, %c0_0] : memref<16x1xi32, #tpu.memory_space<vmem>>, vector<16x1xi32>
    %1 = tpu.iota {dimensions = array<i32: 1>} : vector<16x64xi32>
    %2 = vector.broadcast %0 : vector<16x1xi32> to vector<16x64xi32>
    %3 = arith.cmpi eq, %2, %1 : vector<16x64xi32>
    %4 = arith.extui %3 : vector<16x64xi1> to vector<16x64xi32>
    %5 = arith.sitofp %4 : vector<16x64xi32> to vector<16x64xf32>
    %c0_1 = arith.constant 0 : index
    %c0_2 = arith.constant 0 : index
    %6 = vector.load %arg2[%c0_1, %c0_2] : memref<64x128xf32, #tpu.memory_space<vmem>>, vector<64x128xf32>
    %cst = arith.constant dense<0.000000e+00> : vector<16x128xf32>
    %7 = tpu.matmul %5, %6, %cst {dimension_numbers = #tpu.dot_dimension_numbers<[1], [0], [0], [1], [0, 0, 1, 1], [], []>, precision = #tpu.contract_precision<fp32>} : vector<16x64xf32>, vector<64x128xf32>, vector<16x128xf32> -> vector<16x128xf32>
    %c0_3 = arith.constant 0 : index
    %c0_4 = arith.constant 0 : index
    %8 = vector.load %arg3[%c0_3, %c0_4] : memref<16x128xf32, #tpu.memory_space<vmem>>, vector<16x128xf32>
    tpu.vector_store %arg3[%c0_3, %c0_4], %7 {strides = array<i32>} : memref<16x128xf32, #tpu.memory_space<vmem>>, vector<16x128xf32>,
    return
  }
  func.func @transform_0(%arg0: i32) -> (i32, i32) {
    %c0_i32 = arith.constant 0 : i32
    %c0_i32_0 = arith.constant 0 : i32
    return %arg0, %c0_i32 : i32, i32
  }
  func.func @transform_1(%arg0: i32) -> (i32, i32) {
    %c0_i32 = arith.constant 0 : i32
    %c0_i32_0 = arith.constant 0 : i32
    %c0_i32_1 = arith.constant 0 : i32
    return %c0_i32, %c0_i32_0 : i32, i32
  }
  func.func @transform_2(%arg0: i32) -> (i32, i32) {
    %c0_i32 = arith.constant 0 : i32
    %c0_i32_0 = arith.constant 0 : i32
    return %arg0, %c0_i32 : i32, i32
  }
}

</mosaic_0001>

<bundles_post_ra>
// kernel: tpu_custom_call.1
= control target key start
LH: loop header
LB: loop body
LE: loop exit
PB: predicated region body
PF: predicated region fallthrough
CT: control target
= control target key end

     0   :  { %7 = vsyncpa [#allocation3], 0  ;;  %s537_s0 = inlined_call_operand.vmem [shape: s32[16,1], index: 0, kind: input, shape index: {}]   ;;  %s538_s1 = inlined_call_operand.hbm [shape: f32[64,128], index: 1, kind: input, shape index: {}]   ;;  %s539_s2 = inlined_call_operand.hbm [shape: f32[16,128], index: 2, kind: output, shape index: {}]  }
   0x1   :  { %8 = vsyncpa [#allocation4], 0  ;;  %s15_s11 = sshll.u32 %s538_s1, 4  ;;  %s431_s12 = smov [#allocation2]   ;;  %s16_s11 = int_to_ptr.hbm [resolvable:$true] %s15_s11 }
   0x2   :  { %s17_s13 = sshll.u32 %s431_s12, 4  ;;  %s432_s14 = smov 128   ;;  %s18_s13 = int_to_ptr.vmem [resolvable:$true] %s17_s13 }
   0x3   :  { %s433_s15 = smov 8  }
   0x4   :  { %23 = dma.hbm_to_vmem [thread:$0]  %s16_s11, 1024, %s18_s13, [#allocation3], %s432_s14, %s432_s14, %s433_s15  }
   0x5   :  { %427 = dma.done.wait [#allocation3], 1024  }
   0x6   :  { %428 = vsyncadd [#allocation3], 4294966272  ;;  %v434_v0 = vmov 0   ;;  %v28_v1 = vld [vmem:[%s537_s0] sm:$0xff]  ;;  %v51_v2 = vld [vmem:[#allocation2 + $0x38] sm:$0xff]  ;;  %v30_v51 = vlaneseq  ;;  %vm52_vm0 = vcmask 523264  }
   0x7   :  { %378 = vset.pattern.permute.xlu0 %v434_v0  ;;  %v461_v3 = vand.u32 4294901760, %v51_v2  ;;  %v50_v4 = vld [vmem:[#allocation2 + $0x30] sm:$0xff]  ;;  %v49_v5 = vld [vmem:[#allocation2 + $0x28] sm:$0xff]  ;;  %v48_v6 = vld [vmem:[#allocation2 + $0x20] sm:$0xff]  ;;  %v435_v54 = vmov 0.0   ;;  %s335_s22 = sshll.u32 %s539_s2, 4  ;;  %s336_s22 = int_to_ptr.hbm [resolvable:$true] %s335_s22 }
   0x8   :  { %33 = vperm.xlu0 %378, %v28_v1   ;;  %v463_v7 = vand.u32 4294901760, %v50_v4  ;;  %v465_v8 = vand.u32 4294901760, %v49_v5  ;;  %v467_v9 = vand.u32 4294901760, %v48_v6  ;;  %v47_v10 = vld [vmem:[#allocation2 + $0x18] sm:$0xff]  ;;  %v46_v11 = vld [vmem:[#allocation2 + $0x10] sm:$0xff]  ;;  %v45_v12 = vld [vmem:[#allocation2 + $0x8] sm:$0xff] }
   0x9   :  { %v109_v13 = vsub.f32 %v51_v2, %v461_v3  ;;  %217 = vmatpush.msra.mxu3 %v461_v3  ;;  %v471_v14 = vand.u32 4294901760, %v47_v10  ;;  %68 = vmatpush.msra.mxu0 %v461_v3  ;;  %v474_v15 = vand.u32 4294901760, %v46_v11  ;;  %v476_v16 = vand.u32 4294901760, %v45_v12  ;;  %v29_v23 = vld [vmem:[%s537_s0 + $0x8] sm:$0xff]  ;;  %v44_v45 = vld [vmem:[#allocation2] sm:$0xff]  ;;  %s436_s0 = smov [#allocation5]  }
   0xa   :  { %v115_v17 = vsub.f32 %v50_v4, %v463_v7  ;;  %v121_v18 = vsub.f32 %v49_v5, %v465_v8  ;;  %v127_v19 = vsub.f32 %v48_v6, %v467_v9  ;;  %v81_v46 = vand.u32 4294901760, %v44_v45  ;;  %s333_s19 = sshll.u32 %s436_s0, 4  ;;  %s334_s19 = int_to_ptr.vmem [resolvable:$true] %s333_s19 }
   0xb   :  { %v110_v20 = vand.u32 4294901760, %v109_v13  ;;  %175 = vmatpush.msra.mxu2 %v109_v13  ;;  %219 = vmatpush.msra.mxu3 %v463_v7  ;;  %v133_v21 = vsub.f32 %v47_v10, %v471_v14  ;;  %v139_v22 = vsub.f32 %v46_v11, %v474_v15  ;;  %v145_v29 = vsub.f32 %v45_v12, %v476_v16 }
   0xc   :  { %v116_v24 = vand.u32 4294901760, %v115_v17  ;;  %v122_v25 = vand.u32 4294901760, %v121_v18  ;;  %v487_v26 = vand.u32 4294901760, %v127_v19  ;;  %70 = vmatpush.msra.mxu0 %v463_v7  ;;  %v151_v47 = vsub.f32 %v44_v45, %v81_v46 }
   0xd   :  { %v111_v27 = vsub.f32 %v109_v13, %v110_v20  ;;  %178 = vmatpush.msra.mxu2 %v115_v17  ;;  %v490_v28 = vand.u32 4294901760, %v133_v21  ;;  %221 = vmatpush.msra.mxu3 %v465_v8  ;;  %v140_v34 = vand.u32 4294901760, %v139_v22  ;;  %v146_v38 = vand.u32 4294901760, %v145_v29 }
   0xe   :  { %v117_v30 = vsub.f32 %v115_v17, %v116_v24  ;;  %v123_v31 = vsub.f32 %v121_v18, %v122_v25  ;;  %72 = vmatpush.msra.mxu0 %v465_v8  ;;  %v129_v33 = vsub.f32 %v127_v19, %v487_v26  ;;  %v152_v48 = vand.u32 4294901760, %v151_v47 }
   0xf   :  { %v112_v32 = vand.u32 4294901760, %v111_v27  ;;  %181 = vmatpush.msra.mxu2 %v121_v18  ;;  %223 = vmatpush.msra.mxu3 %v467_v9  ;;  %v135_v37 = vsub.f32 %v133_v21, %v490_v28  ;;  %v141_v40 = vsub.f32 %v139_v22, %v140_v34  ;;  %v147_v42 = vsub.f32 %v145_v29, %v146_v38 }
  0x10   :  { %36 = vperm.xlu0 %378, %v29_v23   ;;  %v118_v35 = vand.u32 4294901760, %v117_v30  ;;  %74 = vmatpush.msra.mxu0 %v467_v9  ;;  %v124_v36 = vand.u32 4294901760, %v123_v31  ;;  %v130_v39 = vand.u32 4294901760, %v129_v33  ;;  %v153_v49 = vsub.f32 %v151_v47, %v152_v48 }
  0x11   :  { %113 = vmatpush.msra.mxu1 %v112_v32  ;;  %184 = vmatpush.msra.mxu2 %v127_v19  ;;  %v136_v41 = vand.u32 4294901760, %v135_v37  ;;  %v142_v43 = vand.u32 4294901760, %v141_v40  ;;  %v148_v44 = vand.u32 4294901760, %v147_v42  ;;  %v31_v52 = vand.u32 127, %v30_v51 }
  0x12   :  { %225 = vmatpush.msra.mxu3 %v471_v14  ;;  %76 = vmatpush.msra.mxu0 %v471_v14  ;;  %v154_v50 = vand.u32 4294901760, %v153_v49 }
  0x13   :  { %119 = vmatpush.msra.mxu1 %v118_v35  ;;  %187 = vmatpush.msra.mxu2 %v133_v21 }
  0x14   :  { %227 = vmatpush.msra.mxu3 %v474_v15  ;;  %78 = vmatpush.msra.mxu0 %v474_v15 }
  0x15   :  { %125 = vmatpush.msra.mxu1 %v124_v36  ;;  %190 = vmatpush.msra.mxu2 %v139_v22 }
  0x16   :  { %229 = vmatpush.msra.mxu3 %v476_v16  ;;  %80 = vmatpush.msra.mxu0 %v476_v16 }
  0x17   :  { %131 = vmatpush.msra.mxu1 %v130_v39  ;;  %193 = vmatpush.msra.mxu2 %v145_v29 }
  0x18   :  { %231 = vmatpush.msra.mxu3 %v81_v46  ;;  %82 = vmatpush.msra.mxu0 %v81_v46 }
  0x19   :  { %137 = vmatpush.msra.mxu1 %v136_v41  ;;  %196 = vmatpush.msra.mxu2 %v151_v47 }
  0x1a   :  { %364 = vmatpush.msrb.mxu3 %v461_v3  ;;  %256 = vmatpush.msrb.mxu0 %v110_v20 }
  0x1b   :  { %143 = vmatpush.msra.mxu1 %v142_v43  ;;  %356 = vmatpush.msrb.mxu2 %v110_v20 }
  0x1c   :  { %365 = vmatpush.msrb.mxu3 %v463_v7  ;;  %260 = vmatpush.msrb.mxu0 %v116_v24 }
  0x1d   :  { %149 = vmatpush.msra.mxu1 %v148_v44  ;;  %357 = vmatpush.msrb.mxu2 %v116_v24 }
  0x1e   :  { %366 = vmatpush.msrb.mxu3 %v465_v8  ;;  %264 = vmatpush.msrb.mxu0 %v122_v25 }
  0x1f   :  { %358 = vmatpush.msrb.mxu2 %v122_v25  ;;  %155 = vmatpush.msra.mxu1 %v154_v50 }
  0x20   :  { %367 = vmatpush.msrb.mxu3 %v467_v9  ;;  %268 = vmatpush.msrb.mxu0 %v487_v26 }
  0x21   :  { %303 = vmatpush.msrb.mxu1 %v461_v3  ;;  %359 = vmatpush.msrb.mxu2 %v487_v26 }
  0x22   :  { %368 = vmatpush.msrb.mxu3 %v471_v14  ;;  %272 = vmatpush.msrb.mxu0 %v490_v28 }
  0x23   :  { %305 = vmatpush.msrb.mxu1 %v463_v7  ;;  %360 = vmatpush.msrb.mxu2 %v490_v28 }
  0x24   :  { %369 = vmatpush.msrb.mxu3 %v474_v15  ;;  %276 = vmatpush.msrb.mxu0 %v140_v34 }
  0x25   :  { %307 = vmatpush.msrb.mxu1 %v465_v8  ;;  %361 = vmatpush.msrb.mxu2 %v140_v34 }
  0x26   :  { %370 = vmatpush.msrb.mxu3 %v476_v16  ;;  %280 = vmatpush.msrb.mxu0 %v146_v38 }
  0x27   :  { %309 = vmatpush.msrb.mxu1 %v467_v9  ;;  %362 = vmatpush.msrb.mxu2 %v146_v38 }
  0x28   :  { %371 = vmatpush.msrb.mxu3 %v81_v46  ;;  %284 = vmatpush.msrb.mxu0 %v152_v48 }
  0x29   :  { %311 = vmatpush.msrb.mxu1 %v471_v14  ;;  %363 = vmatpush.msrb.mxu2 %v152_v48 }
  0x2b   :  { %313 = vmatpush.msrb.mxu1 %v474_v15 }
  0x2d   :  { %315 = vmatpush.msrb.mxu1 %v476_v16 }
  0x2f   :  { %317 = vmatpush.msrb.mxu1 %v81_v46 }
  0x7a   :  { %v34_v53 = vpop.permute.xlu0 %33 }
  0x7b   :  { %vm38_vm1 = vcmp.eq.s32.totalorder %v34_v53, %v31_v52 }
  0x7c   :  { %v348_v55 = vsel %vm38_vm1, 1.0, %v435_v54 }
  0x7d   :  { %350 = vmatmul.msk.f32.vlgmr.msra.gmra.mxu1 %vm52_vm0, %v348_v55  ;;  %v54_v56 = vsel %vm52_vm0, %v348_v55, 0 }
  0x7e   :  { %v84_v57 = vsub.f32 %v54_v56, %v54_v56 }
  0x80   :  { %199 = vmatmul.f32.vlgmr.msra.gmra.mxu2 %v84_v57  ;;  %v85_v58 = vand.u32 4294901760, %v84_v57 }
  0x82   :  { %235 = vmatmul.f32.vlgmr.msra.gmra.mxu3 %v85_v58  ;;  %v37_v59 = vpop.permute.xlu0 %36  ;;  %v86_v60 = vsub.f32 %v84_v57, %v85_v58 }
  0x83   :  { %vm39_vm2 = vcmp.eq.s32.totalorder %v37_v59, %v31_v52 }
  0x84   :  { %v349_v61 = vsel %vm39_vm2, 1.0, %v435_v54  ;;  %v87_v62 = vand.u32 4294901760, %v86_v60 }
  0x85   :  { %351 = vmatmul.msk.f32.gmra.mxu1 %vm52_vm0, %v349_v61  ;;  %v57_v63 = vsel %vm52_vm0, %v349_v61, 0 }
  0x86   :  { %88 = vmatmul.f32.vlgmr.msra.gmra.mxu0 %v87_v62  ;;  %v92_v0 = vsub.f32 %v57_v63, %v57_v63 }
  0x88   :  { %204 = vmatmul.f32.gmra.mxu2 %v92_v0  ;;  %v93_v1 = vand.u32 4294901760, %v92_v0 }
  0x8a   :  { %241 = vmatmul.f32.gmra.mxu3 %v93_v1  ;;  %v94_v2 = vsub.f32 %v92_v0, %v93_v1 }
  0x8c   :  { %v95_v3 = vand.u32 4294901760, %v94_v2 }
  0x8d   :  { %354 = vmatmul.msk.f32.vlgmr.msrb.gmra.mxu1 %vm52_vm0, %v348_v55 }
  0x8e   :  { %96 = vmatmul.f32.gmra.mxu0 %v95_v3 }
  0x90   :  { %353 = vmatmul.msk.f32.vlgmr.msrb.gmra.mxu2 %vm52_vm0, %v349_v61 }
  0x92   :  { %355 = vmatmul.msk.f32.vlgmr.msrb.gmra.mxu3 %vm52_vm0, %v349_v61 }
  0x96   :  { %352 = vmatmul.msk.f32.vlgmr.msrb.gmra.mxu0 %vm52_vm0, %v348_v55 }
  0xfa   :  { %v158_v4 = vpop.f32.mrf.mxu1 }
 0x102   :  { %v162_v8 = vpop.f32.mrf.mxu1 }
 0x103   :  { %v89_v5 = vpop.f32.mrf.mxu0  ;;  %v200_v6 = vpop.f32.mrf.mxu2 }
 0x104   :  { %v159_v9 = vadd.f32 %v158_v4, %v89_v5 }
 0x105   :  { %v236_v7 = vpop.f32.mrf.mxu3 }
 0x106   :  { %v201_v14 = vadd.f32 %v200_v6, %v159_v9 }
 0x108   :  { %v237_v16 = vadd.f32 %v236_v7, %v201_v14 }
 0x10a   :  { %v320_v22 = vpop.f32.mrf.mxu1 }
 0x10b   :  { %v97_v10 = vpop.f32.mrf.mxu0  ;;  %v205_v11 = vpop.f32.mrf.mxu2 }
 0x10c   :  { %v163_v12 = vadd.f32 %v162_v8, %v97_v10 }
 0x10d   :  { %v242_v13 = vpop.f32.mrf.mxu3 }
 0x10e   :  { %v206_v15 = vadd.f32 %v205_v11, %v163_v12 }
 0x110   :  { %v243_v17 = vadd.f32 %v242_v13, %v206_v15 }
 0x113   :  { %v287_v18 = vpop.f32.mrf.mxu0  ;;  %v291_v19 = vpop.f32.mrf.mxu2 }
 0x114   :  { %v288_v20 = vadd.f32 %v287_v18, %v237_v16  ;;  %v292_v21 = vadd.f32 %v291_v19, %v243_v17 }
 0x115   :  { %v324_v23 = vpop.f32.mrf.mxu3 }
 0x116   :  { %v321_v24 = vadd.f32 %v320_v22, %v288_v20  ;;  %v325_v25 = vadd.f32 %v324_v23, %v292_v21 }
 0x118   :  { %327 = vst [vmem:[#allocation5] sm:$0xff] %v321_v24 }
 0x119   :  { %328 = vst [vmem:[#allocation5 + $0x8] sm:$0xff] %v325_v25 }
 0x11a   :  { %341 = dma.vmem_to_hbm [thread:$0]  %s334_s19, 256, %s336_s22, [#allocation4], %s432_s14, %s432_s14, %s433_s15  }
 0x11b   :  { %429 = dma.done.wait [#allocation4], 256  }
 0x11c   :  { %430 = vsyncadd [#allocation4], 4294967040 }
 0x11d   :  { %346 = vsyncpa [#allocation3], 1 }
 0x11e   :  { %347 = vsyncpa [#allocation4], 1 }

// kernel: tpu_custom_call.1
= control target key start
LH: loop header
LB: loop body
LE: loop exit
PB: predicated region body
PF: predicated region fallthrough
CT: control target
= control target key end

     0   :  { %7 = vsyncpa [#allocation3], 0  ;;  %s537_s0 = inlined_call_operand.vmem [shape: s32[16,1], index: 0, kind: input, shape index: {}]   ;;  %s538_s1 = inlined_call_operand.hbm [shape: f32[64,128], index: 1, kind: input, shape index: {}]   ;;  %s539_s2 = inlined_call_operand.hbm [shape: f32[16,128], index: 2, kind: output, shape index: {}]  }
   0x1   :  { %8 = vsyncpa [#allocation4], 0  ;;  %s15_s11 = sshll.u32 %s538_s1, 4  ;;  %s431_s12 = smov [#allocation2]   ;;  %s16_s11 = int_to_ptr.hbm [resolvable:$true] %s15_s11 }
   0x2   :  { %s17_s13 = sshll.u32 %s431_s12, 4  ;;  %s432_s14 = smov 128   ;;  %s18_s13 = int_to_ptr.vmem [resolvable:$true] %s17_s13 }
   0x3   :  { %s433_s15 = smov 8  }
   0x4   :  { %23 = dma.hbm_to_vmem [thread:$0]  %s16_s11, 1024, %s18_s13, [#allocation3], %s432_s14, %s432_s14, %s433_s15  }
   0x5   :  { %427 = dma.done.wait [#allocation3], 1024  }
   0x6   :  { %428 = vsyncadd [#allocation3], 4294966272  ;;  %v434_v0 = vmov 0   ;;  %v28_v1 = vld [vmem:[%s537_s0] sm:$0xff]  ;;  %v51_v2 = vld [vmem:[#allocation2 + $0x38] sm:$0xff]  ;;  %v30_v51 = vlaneseq  ;;  %vm52_vm0 = vcmask 523264  }
   0x7   :  { %378 = vset.pattern.permute.xlu0 %v434_v0  ;;  %v461_v3 = vand.u32 4294901760, %v51_v2  ;;  %v50_v4 = vld [vmem:[#allocation2 + $0x30] sm:$0xff]  ;;  %v49_v5 = vld [vmem:[#allocation2 + $0x28] sm:$0xff]  ;;  %v48_v6 = vld [vmem:[#allocation2 + $0x20] sm:$0xff]  ;;  %v435_v54 = vmov 0.0   ;;  %s335_s22 = sshll.u32 %s539_s2, 4  ;;  %s336_s22 = int_to_ptr.hbm [resolvable:$true] %s335_s22 }
   0x8   :  { %33 = vperm.xlu0 %378, %v28_v1   ;;  %v463_v7 = vand.u32 4294901760, %v50_v4  ;;  %v465_v8 = vand.u32 4294901760, %v49_v5  ;;  %v467_v9 = vand.u32 4294901760, %v48_v6  ;;  %v47_v10 = vld [vmem:[#allocation2 + $0x18] sm:$0xff]  ;;  %v46_v11 = vld [vmem:[#allocation2 + $0x10] sm:$0xff]  ;;  %v45_v12 = vld [vmem:[#allocation2 + $0x8] sm:$0xff] }
   0x9   :  { %v109_v13 = vsub.f32 %v51_v2, %v461_v3  ;;  %217 = vmatpush.msra.mxu3 %v461_v3  ;;  %v471_v14 = vand.u32 4294901760, %v47_v10  ;;  %68 = vmatpush.msra.mxu0 %v461_v3  ;;  %v474_v15 = vand.u32 4294901760, %v46_v11  ;;  %v476_v16 = vand.u32 4294901760, %v45_v12  ;;  %v29_v23 = vld [vmem:[%s537_s0 + $0x8] sm:$0xff]  ;;  %v44_v45 = vld [vmem:[#allocation2] sm:$0xff]  ;;  %s436_s0 = smov [#allocation5]  }
   0xa   :  { %v115_v17 = vsub.f32 %v50_v4, %v463_v7  ;;  %v121_v18 = vsub.f32 %v49_v5, %v465_v8  ;;  %v127_v19 = vsub.f32 %v48_v6, %v467_v9  ;;  %v81_v46 = vand.u32 4294901760, %v44_v45  ;;  %s333_s19 = sshll.u32 %s436_s0, 4  ;;  %s334_s19 = int_to_ptr.vmem [resolvable:$true] %s333_s19 }
   0xb   :  { %v110_v20 = vand.u32 4294901760, %v109_v13  ;;  %175 = vmatpush.msra.mxu2 %v109_v13  ;;  %219 = vmatpush.msra.mxu3 %v463_v7  ;;  %v133_v21 = vsub.f32 %v47_v10, %v471_v14  ;;  %v139_v22 = vsub.f32 %v46_v11, %v474_v15  ;;  %v145_v29 = vsub.f32 %v45_v12, %v476_v16 }
   0xc   :  { %v116_v24 = vand.u32 4294901760, %v115_v17  ;;  %v122_v25 = vand.u32 4294901760, %v121_v18  ;;  %v487_v26 = vand.u32 4294901760, %v127_v19  ;;  %70 = vmatpush.msra.mxu0 %v463_v7  ;;  %v151_v47 = vsub.f32 %v44_v45, %v81_v46 }
   0xd   :  { %v111_v27 = vsub.f32 %v109_v13, %v110_v20  ;;  %178 = vmatpush.msra.mxu2 %v115_v17  ;;  %v490_v28 = vand.u32 4294901760, %v133_v21  ;;  %221 = vmatpush.msra.mxu3 %v465_v8  ;;  %v140_v34 = vand.u32 4294901760, %v139_v22  ;;  %v146_v38 = vand.u32 4294901760, %v145_v29 }
   0xe   :  { %v117_v30 = vsub.f32 %v115_v17, %v116_v24  ;;  %v123_v31 = vsub.f32 %v121_v18, %v122_v25  ;;  %72 = vmatpush.msra.mxu0 %v465_v8  ;;  %v129_v33 = vsub.f32 %v127_v19, %v487_v26  ;;  %v152_v48 = vand.u32 4294901760, %v151_v47 }
   0xf   :  { %v112_v32 = vand.u32 4294901760, %v111_v27  ;;  %181 = vmatpush.msra.mxu2 %v121_v18  ;;  %223 = vmatpush.msra.mxu3 %v467_v9  ;;  %v135_v37 = vsub.f32 %v133_v21, %v490_v28  ;;  %v141_v40 = vsub.f32 %v139_v22, %v140_v34  ;;  %v147_v42 = vsub.f32 %v145_v29, %v146_v38 }
  0x10   :  { %36 = vperm.xlu0 %378, %v29_v23   ;;  %v118_v35 = vand.u32 4294901760, %v117_v30  ;;  %74 = vmatpush.msra.mxu0 %v467_v9  ;;  %v124_v36 = vand.u32 4294901760, %v123_v31  ;;  %v130_v39 = vand.u32 4294901760, %v129_v33  ;;  %v153_v49 = vsub.f32 %v151_v47, %v152_v48 }
  0x11   :  { %113 = vmatpush.msra.mxu1 %v112_v32  ;;  %184 = vmatpush.msra.mxu2 %v127_v19  ;;  %v136_v41 = vand.u32 4294901760, %v135_v37  ;;  %v142_v43 = vand.u32 4294901760, %v141_v40  ;;  %v148_v44 = vand.u32 4294901760, %v147_v42  ;;  %v31_v52 = vand.u32 127, %v30_v51 }
  0x12   :  { %225 = vmatpush.msra.mxu3 %v471_v14  ;;  %76 = vmatpush.msra.mxu0 %v471_v14  ;;  %v154_v50 = vand.u32 4294901760, %v153_v49 }
  0x13   :  { %119 = vmatpush.msra.mxu1 %v118_v35  ;;  %187 = vmatpush.msra.mxu2 %v133_v21 }
  0x14   :  { %227 = vmatpush.msra.mxu3 %v474_v15  ;;  %78 = vmatpush.msra.mxu0 %v474_v15 }
  0x15   :  { %125 = vmatpush.msra.mxu1 %v124_v36  ;;  %190 = vmatpush.msra.mxu2 %v139_v22 }
  0x16   :  { %229 = vmatpush.msra.mxu3 %v476_v16  ;;  %80 = vmatpush.msra.mxu0 %v476_v16 }
  0x17   :  { %131 = vmatpush.msra.mxu1 %v130_v39  ;;  %193 = vmatpush.msra.mxu2 %v145_v29 }
  0x18   :  { %231 = vmatpush.msra.mxu3 %v81_v46  ;;  %82 = vmatpush.msra.mxu0 %v81_v46 }
  0x19   :  { %137 = vmatpush.msra.mxu1 %v136_v41  ;;  %196 = vmatpush.msra.mxu2 %v151_v47 }
  0x1a   :  { %364 = vmatpush.msrb.mxu3 %v461_v3  ;;  %256 = vmatpush.msrb.mxu0 %v110_v20 }
  0x1b   :  { %143 = vmatpush.msra.mxu1 %v142_v43  ;;  %356 = vmatpush.msrb.mxu2 %v110_v20 }
  0x1c   :  { %365 = vmatpush.msrb.mxu3 %v463_v7  ;;  %260 = vmatpush.msrb.mxu0 %v116_v24 }
  0x1d   :  { %149 = vmatpush.msra.mxu1 %v148_v44  ;;  %357 = vmatpush.msrb.mxu2 %v116_v24 }
  0x1e   :  { %366 = vmatpush.msrb.mxu3 %v465_v8  ;;  %264 = vmatpush.msrb.mxu0 %v122_v25 }
  0x1f   :  { %358 = vmatpush.msrb.mxu2 %v122_v25  ;;  %155 = vmatpush.msra.mxu1 %v154_v50 }
  0x20   :  { %367 = vmatpush.msrb.mxu3 %v467_v9  ;;  %268 = vmatpush.msrb.mxu0 %v487_v26 }
  0x21   :  { %303 = vmatpush.msrb.mxu1 %v461_v3  ;;  %359 = vmatpush.msrb.mxu2 %v487_v26 }
  0x22   :  { %368 = vmatpush.msrb.mxu3 %v471_v14  ;;  %272 = vmatpush.msrb.mxu0 %v490_v28 }
  0x23   :  { %305 = vmatpush.msrb.mxu1 %v463_v7  ;;  %360 = vmatpush.msrb.mxu2 %v490_v28 }
  0x24   :  { %369 = vmatpush.msrb.mxu3 %v474_v15  ;;  %276 = vmatpush.msrb.mxu0 %v140_v34 }
  0x25   :  { %307 = vmatpush.msrb.mxu1 %v465_v8  ;;  %361 = vmatpush.msrb.mxu2 %v140_v34 }
  0x26   :  { %370 = vmatpush.msrb.mxu3 %v476_v16  ;;  %280 = vmatpush.msrb.mxu0 %v146_v38 }
  0x27   :  { %309 = vmatpush.msrb.mxu1 %v467_v9  ;;  %362 = vmatpush.msrb.mxu2 %v146_v38 }
  0x28   :  { %371 = vmatpush.msrb.mxu3 %v81_v46  ;;  %284 = vmatpush.msrb.mxu0 %v152_v48 }
  0x29   :  { %311 = vmatpush.msrb.mxu1 %v471_v14  ;;  %363 = vmatpush.msrb.mxu2 %v152_v48 }
  0x2b   :  { %313 = vmatpush.msrb.mxu1 %v474_v15 }
  0x2d   :  { %315 = vmatpush.msrb.mxu1 %v476_v16 }
  0x2f   :  { %317 = vmatpush.msrb.mxu1 %v81_v46 }
  0x7a   :  { %v34_v53 = vpop.permute.xlu0 %33 }
  0x7b   :  { %vm38_vm1 = vcmp.eq.s32.totalorder %v34_v53, %v31_v52 }
  0x7c   :  { %v348_v55 = vsel %vm38_vm1, 1.0, %v435_v54 }
  0x7d   :  { %350 = vmatmul.msk.f32.vlgmr.msra.gmra.mxu1 %vm52_vm0, %v348_v55  ;;  %v54_v56 = vsel %vm52_vm0, %v348_v55, 0 }
  0x7e   :  { %v84_v57 = vsub.f32 %v54_v56, %v54_v56 }
  0x80   :  { %199 = vmatmul.f32.vlgmr.msra.gmra.mxu2 %v84_v57  ;;  %v85_v58 = vand.u32 4294901760, %v84_v57 }
  0x82   :  { %235 = vmatmul.f32.vlgmr.msra.gmra.mxu3 %v85_v58  ;;  %v37_v59 = vpop.permute.xlu0 %36  ;;  %v86_v60 = vsub.f32 %v84_v57, %v85_v58 }
  0x83   :  { %vm39_vm2 = vcmp.eq.s32.totalorder %v37_v59, %v31_v52 }
  0x84   :  { %v349_v61 = vsel %vm39_vm2, 1.0, %v435_v54  ;;  %v87_v62 = vand.u32 4294901760, %v86_v60 }
  0x85   :  { %351 = vmatmul.msk.f32.gmra.mxu1 %vm52_vm0, %v349_v61  ;;  %v57_v63 = vsel %vm52_vm0, %v349_v61, 0 }
  0x86   :  { %88 = vmatmul.f32.vlgmr.msra.gmra.mxu0 %v87_v62  ;;  %v92_v0 = vsub.f32 %v57_v63, %v57_v63 }
  0x88   :  { %204 = vmatmul.f32.gmra.mxu2 %v92_v0  ;;  %v93_v1 = vand.u32 4294901760, %v92_v0 }
  0x8a   :  { %241 = vmatmul.f32.gmra.mxu3 %v93_v1  ;;  %v94_v2 = vsub.f32 %v92_v0, %v93_v1 }
  0x8c   :  { %v95_v3 = vand.u32 4294901760, %v94_v2 }
  0x8d   :  { %354 = vmatmul.msk.f32.vlgmr.msrb.gmra.mxu1 %vm52_vm0, %v348_v55 }
  0x8e   :  { %96 = vmatmul.f32.gmra.mxu0 %v95_v3 }
  0x90   :  { %353 = vmatmul.msk.f32.vlgmr.msrb.gmra.mxu2 %vm52_vm0, %v349_v61 }
  0x92   :  { %355 = vmatmul.msk.f32.vlgmr.msrb.gmra.mxu3 %vm52_vm0, %v349_v61 }
  0x96   :  { %352 = vmatmul.msk.f32.vlgmr.msrb.gmra.mxu0 %vm52_vm0, %v348_v55 }
  0xfa   :  { %v158_v4 = vpop.f32.mrf.mxu1 }
 0x102   :  { %v162_v8 = vpop.f32.mrf.mxu1 }
 0x103   :  { %v89_v5 = vpop.f32.mrf.mxu0  ;;  %v200_v6 = vpop.f32.mrf.mxu2 }
 0x104   :  { %v159_v9 = vadd.f32 %v158_v4, %v89_v5 }
 0x105   :  { %v236_v7 = vpop.f32.mrf.mxu3 }
 0x106   :  { %v201_v14 = vadd.f32 %v200_v6, %v159_v9 }
 0x108   :  { %v237_v16 = vadd.f32 %v236_v7, %v201_v14 }
 0x10a   :  { %v320_v22 = vpop.f32.mrf.mxu1 }
 0x10b   :  { %v97_v10 = vpop.f32.mrf.mxu0  ;;  %v205_v11 = vpop.f32.mrf.mxu2 }
 0x10c   :  { %v163_v12 = vadd.f32 %v162_v8, %v97_v10 }
 0x10d   :  { %v242_v13 = vpop.f32.mrf.mxu3 }
 0x10e   :  { %v206_v15 = vadd.f32 %v205_v11, %v163_v12 }
 0x110   :  { %v243_v17 = vadd.f32 %v242_v13, %v206_v15 }
 0x113   :  { %v287_v18 = vpop.f32.mrf.mxu0  ;;  %v291_v19 = vpop.f32.mrf.mxu2 }
 0x114   :  { %v288_v20 = vadd.f32 %v287_v18, %v237_v16  ;;  %v292_v21 = vadd.f32 %v291_v19, %v243_v17 }
 0x115   :  { %v324_v23 = vpop.f32.mrf.mxu3 }
 0x116   :  { %v321_v24 = vadd.f32 %v320_v22, %v288_v20  ;;  %v325_v25 = vadd.f32 %v324_v23, %v292_v21 }
 0x118   :  { %327 = vst [vmem:[#allocation5] sm:$0xff] %v321_v24 }
 0x119   :  { %328 = vst [vmem:[#allocation5 + $0x8] sm:$0xff] %v325_v25 }
 0x11a   :  { %341 = dma.vmem_to_hbm [thread:$0]  %s334_s19, 256, %s336_s22, [#allocation4], %s432_s14, %s432_s14, %s433_s15  }
 0x11b   :  { %429 = dma.done.wait [#allocation4], 256  }
 0x11c   :  { %430 = vsyncadd [#allocation4], 4294967040 }
 0x11d   :  { %346 = vsyncpa [#allocation3], 1 }
 0x11e   :  { %347 = vsyncpa [#allocation4], 1 }

</bundles_post_ra>
